<compile_context>
chip_gen: v5e
topology: v5e:2x2
jax: 0.10.0
libtpu: 0.0.40
codegen_flags: <defaults>
</compile_context>

<pallas_src>
import math
import functools

import jax
import jax.numpy as jnp
from jax import lax
from jax.experimental import pallas as pl
from jax.experimental.pallas import tpu as pltpu


def mha_kernel(x_ref, wq_ref, bq_ref, wkv_ref, bkv_ref, wo_ref, bo_ref,
               o_ref, q_scratch, acc_ref, *,
               head_num, head_dim, hd_pad, kv_tile, exp_dtype):
    """Grid = (batch, key-tile). Key-tile axis is a sequential reduction into acc_ref.

    x_ref:    (S, H)   f32   (batch dim squeezed)
    wq_ref:   (H, Hp)  bf16   bq_ref:  (1, Hp)   f32
    wkv_ref:  (H, 2Hp) bf16   bkv_ref: (1, 2Hp)  f32
    wo_ref:   (Hp, H)  bf16   bo_ref:  (1, H)    f32
    q_scratch:(S, Hp)  bf16 (pre-scaled by 1/sqrt(head_dim))
    acc_ref:  (S, Hp)  f32  (per-head outputs, concat layout)
    """
    kj = pl.program_id(1)
    nk = pl.num_programs(1)
    hidden_p = head_num * hd_pad

    # ---- once per batch row: project Q (all heads), fold scale, zero the slab.
    @pl.when(kj == 0)
    def _init():
        x_bf = x_ref[...].astype(jnp.bfloat16)                               # (S, H)
        q = jnp.dot(x_bf, wq_ref[...],
                    preferred_element_type=jnp.float32) + bq_ref[...]        # (S, Hp)
        q_scratch[...] = (q * (1.0 / math.sqrt(head_dim))).astype(jnp.bfloat16)
        acc_ref[...] = jnp.zeros_like(acc_ref)

    # ---- every key tile: slice keys from the already-resident X row (no 2nd stream).
    start = pl.multiple_of(kj * kv_tile, kv_tile)
    xk = x_ref[pl.ds(start, kv_tile), :].astype(jnp.bfloat16)                # (TK, H)
    kv = jnp.dot(xk, wkv_ref[...],
                 preferred_element_type=jnp.float32) + bkv_ref[...]          # (TK, 2Hp)
    kv = kv.astype(jnp.bfloat16)                                             # one cast, one buffer

    dim_nums = (((1,), (1,)), ((), ()))     # contract head_dim of both; no transpose
    outs = []
    for h in range(head_num):               # static, unrolled (head_num is small)
        lo = h * hd_pad                      # 128-aligned -> unmasked lane slices
        qh = q_scratch[:, lo:lo + hd_pad]                                    # bf16 (S, hdp)
        kh = kv[:, lo:lo + hd_pad]                                           # bf16 (TK, hdp)
        vh = kv[:, hidden_p + lo:hidden_p + lo + hd_pad]                     # bf16 (TK, hdp)

        s = lax.dot_general(qh, kh, dimension_numbers=dim_nums,
                            preferred_element_type=jnp.float32)              # (S, TK)
        # torch softmax dim=1 == QUERY axis (axis 0 of this tile). Each key column
        # normalizes independently -> key tiles need no online-softmax rescaling.
        s = s - jnp.max(s, axis=0, keepdims=True)
        p = jnp.exp(s.astype(exp_dtype)).astype(jnp.float32)                 # EUP; bf16 on v6e/v7x if set
        p = p * pl.reciprocal(jnp.sum(p, axis=0, keepdims=True), approx=True)
        outs.append(jnp.dot(p.astype(jnp.bfloat16), vh,
                            preferred_element_type=jnp.float32))             # (S, hdp)

    # single full-width accumulate per key tile (no masked sub-slice RMWs)
    acc_ref[...] += jnp.concatenate(outs, axis=-1)

    # ---- last key tile: output projection + bias (dropout = identity, eval mode).
    @pl.when(kj == nk - 1)
    def _finalize():
        concat = acc_ref[...].astype(jnp.bfloat16)                           # (S, Hp)
        out = jnp.dot(concat, wo_ref[...],
                      preferred_element_type=jnp.float32) + bo_ref[...]      # (S, H)
        o_ref[...] = out.astype(o_ref.dtype)


def _prepare_kernel_params(params, *, head_num, head_dim, hd_pad):
    """Pad each head's output channels to hd_pad (zeros), fuse K/V, cast weights to bf16.

    Zero-padding is an exact identity: padded Q/K columns are zero (zero weight AND
    zero bias) so QK^T is unchanged; padded V columns give zero head-output columns,
    matched by zero rows in the padded output projection.
    """
    H = params["wq"].shape[0]
    Hp = head_num * hd_pad
    pad = hd_pad - head_dim

    def pad_out(w, b):
        w = jnp.pad(w.reshape(H, head_num, head_dim),
                    [(0, 0), (0, 0), (0, pad)]).reshape(H, Hp)
        b = jnp.pad(b.reshape(1, head_num, head_dim),
                    [(0, 0), (0, 0), (0, pad)]).reshape(1, Hp)
        return w, b

    wq, bq = pad_out(params["wq"], params["bq"])
    wk, bk = pad_out(params["wk"], params["bk"])
    wv, bv = pad_out(params["wv"], params["bv"])
    wo = jnp.pad(params["wo"].reshape(head_num, head_dim, H),
                 [(0, 0), (0, pad), (0, 0)]).reshape(Hp, H)

    return {
        "wq": wq.astype(jnp.bfloat16), "bq": bq,
        "wkv": jnp.concatenate([wk, wv], axis=1).astype(jnp.bfloat16),
        "bkv": jnp.concatenate([bk, bv], axis=1),
        "wo": wo.astype(jnp.bfloat16), "bo": params["bo"],
    }


def multi_head_self_attention(x, params, *, head_num, kv_tile=None,
                              exp_dtype=jnp.float32, pad_head_dim=True):
    """x: (B, S, H) float32. params: unfused reference params (see init_params)."""
    B, S, H = x.shape
    assert H % head_num == 0
    head_dim = H // head_num
    # Lane-pad each head to a multiple of 128 (MXU fill / unmasked slices).
    hd_pad = (-(-head_dim // 128)) * 128 if pad_head_dim else head_dim
    Hp = head_num * hd_pad

    if kv_tile is None:
        # TODO(synk): sweep {256 (v7x), 512, 1024 (v5e/v6e)} at realistic S.
        kv_tile = 512 if S % 512 == 0 else S
    assert S % kv_tile == 0, "key tile must divide sequence length"
    nk = S // kv_tile

    kp = _prepare_kernel_params(params, head_num=head_num,
                                head_dim=head_dim, hd_pad=hd_pad)

    kernel = functools.partial(mha_kernel, head_num=head_num, head_dim=head_dim,
                               hd_pad=hd_pad, kv_tile=kv_tile, exp_dtype=exp_dtype)

    def const(shape):
        return pl.BlockSpec(shape, lambda b, kj: (0, 0))

    flops = (2 * B * S * H * Hp            # Q projection
             + 2 * B * S * H * 2 * Hp      # fused K/V projection
             + 4 * B * S * S * Hp          # scores + attn@V (all heads)
             + 2 * B * S * Hp * H)         # output projection
    bytes_accessed = (4 * B * S * H * 2                      # x in + out (f32)
                      + 2 * (H * Hp + H * 2 * Hp + Hp * H)   # bf16 weights
                      + 4 * (Hp + 2 * Hp + H))               # f32 biases
    cost = pl.CostEstimate(flops=flops,
                           transcendentals=B * head_num * S * S,
                           bytes_accessed=bytes_accessed)

    return pl.pallas_call(
        kernel,
        out_shape=jax.ShapeDtypeStruct((B, S, H), x.dtype),
        grid_spec=pltpu.PrefetchScalarGridSpec(
            num_scalar_prefetch=0,
            grid=(B, nk),                                             # reduction axis last
            in_specs=[
                pl.BlockSpec((None, S, H), lambda b, kj: (b, 0, 0)),  # X (queries + keys)
                const((H, Hp)), const((1, Hp)),                       # Wq (bf16), bq (f32)
                const((H, 2 * Hp)), const((1, 2 * Hp)),               # Wkv (bf16), bkv (f32)
                const((Hp, H)), const((1, H)),                        # Wo (bf16), bo (f32)
            ],
            out_specs=pl.BlockSpec((None, S, H), lambda b, kj: (b, 0, 0)),
            scratch_shapes=[pltpu.VMEM((S, Hp), jnp.bfloat16),   # pre-scaled Q (all heads)
                            pltpu.VMEM((S, Hp), jnp.float32)],   # concat accumulator
        ),
        compiler_params=pltpu.CompilerParams(
            dimension_semantics=("parallel", "arbitrary"),
            vmem_limit_bytes=64 * 1024 * 1024),
        cost_estimate=cost,
    )(x, kp["wq"], kp["bq"], kp["wkv"], kp["bkv"], kp["wo"], kp["bo"])


def init_params(key, hidden_dim, head_num):
    """Per-head (H, head_dim) projections stacked along the output axis
    (matching the ModuleList of SingalHeadAttention heads)."""
    ks = jax.random.split(key, 8)
    H = hidden_dim
    scale = 1.0 / math.sqrt(H)
    u = lambda k, shp: jax.random.uniform(k, shp, jnp.float32, -scale, scale)
    return {
        "wq": u(ks[0], (H, H)), "wk": u(ks[1], (H, H)),
        "wv": u(ks[2], (H, H)), "wo": u(ks[3], (H, H)),
        "bq": u(ks[4], (1, H)), "bk": u(ks[5], (1, H)),
        "bv": u(ks[6], (1, H)), "bo": u(ks[7], (1, H)),
    }


def reference(x, params, head_num):
    """Pure-JAX f32 reference reproducing the PyTorch module semantics."""
    B, S, H = x.shape
    hd = H // head_num
    q = x @ params["wq"] + params["bq"]
    k = x @ params["wk"] + params["bk"]
    v = x @ params["wv"] + params["bv"]
    outs = []
    for h in range(head_num):
        qh = q[..., h * hd:(h + 1) * hd]
        kh = k[..., h * hd:(h + 1) * hd]
        vh = v[..., h * hd:(h + 1) * hd]
        attn = jnp.einsum("bqd,bkd->bqk", qh, kh) / math.sqrt(hd)
        attn = jax.nn.softmax(attn, axis=1)          # torch softmax dim=1 (query axis)
        outs.append(jnp.einsum("bqk,bkd->bqd", attn, vh))
    concat = jnp.concatenate(outs, axis=-1)
    return concat @ params["wo"] + params["bo"]


if __name__ == "__main__":
    B, S, H, head_num = 2, 8, 32, 4

    key = jax.random.PRNGKey(0)
    kx, kp = jax.random.split(key)
    x = jax.random.normal(kx, (B, S, H), dtype=jnp.float32)
    params = init_params(kp, H, head_num)

    out = multi_head_self_attention(x, params, head_num=head_num)
    out = jax.block_until_ready(out)

    ref = reference(x, params, head_num)
    assert out.shape == (B, S, H)
    # Kernel runs matmuls in bf16 (f32 accumulation) + approx reciprocal,
    # so compare against the f32 reference with a bf16-appropriate tolerance.
    assert jnp.allclose(out, ref, atol=2e-2, rtol=2e-2), \
        f"max err {jnp.max(jnp.abs(out - ref))}"

    print("KERNEL_OK")
</pallas_src>

<mosaic_0001>
module attributes {stable_mosaic.version = 11 : i64} {
  func.func @mha_kernel(%arg0: i32, %arg1: i32, %arg2: memref<1x8x32xf32, #tpu.memory_space<vmem>>, %arg3: memref<32x512xbf16, #tpu.memory_space<vmem>>, %arg4: memref<1x512xf32, #tpu.memory_space<vmem>>, %arg5: memref<32x1024xbf16, #tpu.memory_space<vmem>>, %arg6: memref<1x1024xf32, #tpu.memory_space<vmem>>, %arg7: memref<512x32xbf16, #tpu.memory_space<vmem>>, %arg8: memref<1x32xf32, #tpu.memory_space<vmem>>, %arg9: memref<1x8x32xf32, #tpu.memory_space<vmem>>, %arg10: memref<8x512xbf16, #tpu.memory_space<vmem>>, %arg11: memref<8x512xf32, #tpu.memory_space<vmem>>) attributes {dimension_semantics = [#tpu.dimension_semantics<parallel>, #tpu.dimension_semantics<arbitrary>], iteration_bounds = array<i64: 2, 1>, scalar_prefetch = 0 : i64, scratch_operands = 2 : i64, tpu.core_type = #tpu.core_type<tc>, window_params = [{transform_indices = @transform_0, window_bounds = array<i64: 1, 8, 32>}, {pipeline_mode = #tpu.pipeline_mode<synchronous>, transform_indices = @transform_1, window_bounds = array<i64: 32, 512>}, {pipeline_mode = #tpu.pipeline_mode<synchronous>, transform_indices = @transform_2, window_bounds = array<i64: 1, 512>}, {pipeline_mode = #tpu.pipeline_mode<synchronous>, transform_indices = @transform_3, window_bounds = array<i64: 32, 1024>}, {pipeline_mode = #tpu.pipeline_mode<synchronous>, transform_indices = @transform_4, window_bounds = array<i64: 1, 1024>}, {pipeline_mode = #tpu.pipeline_mode<synchronous>, transform_indices = @transform_5, window_bounds = array<i64: 512, 32>}, {pipeline_mode = #tpu.pipeline_mode<synchronous>, transform_indices = @transform_6, window_bounds = array<i64: 1, 32>}, {transform_indices = @transform_7, window_bounds = array<i64: 1, 8, 32>}]} {
    %c0_i32 = arith.constant 0 : i32
    %0 = arith.cmpi eq, %arg1, %c0_i32 : i32
    %1 = arith.extui %0 : i1 to i32
    %c0_i32_0 = arith.constant 0 : i32
    %2 = arith.cmpi ne, %1, %c0_i32_0 : i32
    scf.if %2 {
      %c0_33 = arith.constant 0 : index
      %c0_34 = arith.constant 0 : index
      %c0_35 = arith.constant 0 : index
      %86 = vector.load %arg2[%c0_33, %c0_34, %c0_35] : memref<1x8x32xf32, #tpu.memory_space<vmem>>, vector<1x8x32xf32>
      %87 = vector.shape_cast %86 : vector<1x8x32xf32> to vector<8x32xf32>
      %88 = arith.truncf %87 : vector<8x32xf32> to vector<8x32xbf16>
      %c0_36 = arith.constant 0 : index
      %c0_37 = arith.constant 0 : index
      %89 = vector.load %arg3[%c0_36, %c0_37] : memref<32x512xbf16, #tpu.memory_space<vmem>>, vector<32x512xbf16>
      %cst_38 = arith.constant dense<0.000000e+00> : vector<8x512xf32>
      %90 = tpu.matmul %88, %89, %cst_38 {dimension_numbers = #tpu.dot_dimension_numbers<[1], [0], [0], [1], [0, 0, 1, 1], [], []>} : vector<8x32xbf16>, vector<32x512xbf16>, vector<8x512xf32> -> vector<8x512xf32>
      %c0_39 = arith.constant 0 : index
      %c0_40 = arith.constant 0 : index
      %91 = vector.load %arg4[%c0_39, %c0_40] : memref<1x512xf32, #tpu.memory_space<vmem>>, vector<1x512xf32>
      %92 = vector.broadcast %91 : vector<1x512xf32> to vector<8x512xf32>
      %93 = arith.addf %90, %92 : vector<8x512xf32>
      %cst_41 = arith.constant 0.353553385 : f32
      %94 = vector.broadcast %cst_41 : f32 to vector<8x512xf32>
      %95 = arith.mulf %93, %94 : vector<8x512xf32>
      %96 = arith.truncf %95 : vector<8x512xf32> to vector<8x512xbf16>
      %c0_42 = arith.constant 0 : index
      %c0_43 = arith.constant 0 : index
      %97 = vector.load %arg10[%c0_42, %c0_43] : memref<8x512xbf16, #tpu.memory_space<vmem>>, vector<8x512xbf16>
      tpu.vector_store %arg10[%c0_42, %c0_43], %96 {strides = array<i32>} : memref<8x512xbf16, #tpu.memory_space<vmem>>, vector<8x512xbf16>,
      %cst_44 = arith.constant 0.000000e+00 : f32
      %98 = vector.broadcast %cst_44 : f32 to vector<8x512xf32>
      %c0_45 = arith.constant 0 : index
      %c0_46 = arith.constant 0 : index
      %99 = vector.load %arg11[%c0_45, %c0_46] : memref<8x512xf32, #tpu.memory_space<vmem>>, vector<8x512xf32>
      tpu.vector_store %arg11[%c0_45, %c0_46], %98 {strides = array<i32>} : memref<8x512xf32, #tpu.memory_space<vmem>>, vector<8x512xf32>,
    } else {
    }
    %c8_i32 = arith.constant 8 : i32
    %3 = arith.muli %arg1, %c8_i32 : i32
    %4 = tpu.assume_multiple %3, 8 : i32
    %c0 = arith.constant 0 : index
    %5 = arith.index_cast %4 : i32 to index
    %c0_1 = arith.constant 0 : index
    %6 = vector.load %arg2[%c0, %5, %c0_1] : memref<1x8x32xf32, #tpu.memory_space<vmem>>, vector<1x8x32xf32>
    %7 = vector.shape_cast %6 : vector<1x8x32xf32> to vector<8x32xf32>
    %8 = arith.truncf %7 : vector<8x32xf32> to vector<8x32xbf16>
    %c0_2 = arith.constant 0 : index
    %c0_3 = arith.constant 0 : index
    %9 = vector.load %arg5[%c0_2, %c0_3] : memref<32x1024xbf16, #tpu.memory_space<vmem>>, vector<32x1024xbf16>
    %cst = arith.constant dense<0.000000e+00> : vector<8x1024xf32>
    %10 = tpu.matmul %8, %9, %cst {dimension_numbers = #tpu.dot_dimension_numbers<[1], [0], [0], [1], [0, 0, 1, 1], [], []>} : vector<8x32xbf16>, vector<32x1024xbf16>, vector<8x1024xf32> -> vector<8x1024xf32>
    %c0_4 = arith.constant 0 : index
    %c0_5 = arith.constant 0 : index
    %11 = vector.load %arg6[%c0_4, %c0_5] : memref<1x1024xf32, #tpu.memory_space<vmem>>, vector<1x1024xf32>
    %12 = vector.broadcast %11 : vector<1x1024xf32> to vector<8x1024xf32>
    %13 = arith.addf %10, %12 : vector<8x1024xf32>
    %14 = arith.truncf %13 : vector<8x1024xf32> to vector<8x1024xbf16>
    %c0_6 = arith.constant 0 : index
    %c0_7 = arith.constant 0 : index
    %15 = vector.load %arg10[%c0_6, %c0_7] : memref<8x512xbf16, #tpu.memory_space<vmem>>, vector<8x128xbf16>
    %16 = vector.extract_strided_slice %14 {offsets = [0, 0], sizes = [8, 128], strides = [1, 1]} : vector<8x1024xbf16> to vector<8x128xbf16>
    %17 = vector.extract_strided_slice %14 {offsets = [0, 512], sizes = [8, 128], strides = [1, 1]} : vector<8x1024xbf16> to vector<8x128xbf16>
    %cst_8 = arith.constant dense<0.000000e+00> : vector<8x8xf32>
    %18 = tpu.matmul %15, %16, %cst_8 {dimension_numbers = #tpu.dot_dimension_numbers<[1], [1], [0], [0], [0, 0, 1, 0], [], []>} : vector<8x128xbf16>, vector<8x128xbf16>, vector<8x8xf32> -> vector<8x8xf32>
    %cst_9 = arith.constant dense<0xFF800000> : vector<8xf32>
    %19 = vector.multi_reduction <maximumf>, %18, %cst_9 [0] : vector<8x8xf32> to vector<8xf32>
    %20 = vector.shape_cast %19 : vector<8xf32> to vector<1x8xf32>
    %21 = vector.broadcast %20 : vector<1x8xf32> to vector<8x8xf32>
    %22 = arith.subf %18, %21 : vector<8x8xf32>
    %23 = math.exp %22 : vector<8x8xf32>
    %cst_10 = arith.constant dense<0.000000e+00> : vector<8xf32>
    %24 = vector.multi_reduction <add>, %23, %cst_10 [0] : vector<8x8xf32> to vector<8xf32>
    %25 = vector.shape_cast %24 : vector<8xf32> to vector<1x8xf32>
    %26 = tpu.reciprocal %25 {approx = true} : vector<1x8xf32> -> vector<1x8xf32>
    %27 = vector.broadcast %26 : vector<1x8xf32> to vector<8x8xf32>
    %28 = arith.mulf %23, %27 : vector<8x8xf32>
    %29 = arith.truncf %28 : vector<8x8xf32> to vector<8x8xbf16>
    %cst_11 = arith.constant dense<0.000000e+00> : vector<8x128xf32>
    %30 = tpu.matmul %29, %17, %cst_11 {dimension_numbers = #tpu.dot_dimension_numbers<[1], [0], [0], [1], [0, 0, 1, 1], [], []>} : vector<8x8xbf16>, vector<8x128xbf16>, vector<8x128xf32> -> vector<8x128xf32>
    %c0_12 = arith.constant 0 : index
    %c128 = arith.constant 128 : index
    %31 = vector.load %arg10[%c0_12, %c128] : memref<8x512xbf16, #tpu.memory_space<vmem>>, vector<8x128xbf16>
    %32 = vector.extract_strided_slice %14 {offsets = [0, 128], sizes = [8, 128], strides = [1, 1]} : vector<8x1024xbf16> to vector<8x128xbf16>
    %33 = vector.extract_strided_slice %14 {offsets = [0, 640], sizes = [8, 128], strides = [1, 1]} : vector<8x1024xbf16> to vector<8x128xbf16>
    %cst_13 = arith.constant dense<0.000000e+00> : vector<8x8xf32>
    %34 = tpu.matmul %31, %32, %cst_13 {dimension_numbers = #tpu.dot_dimension_numbers<[1], [1], [0], [0], [0, 0, 1, 0], [], []>} : vector<8x128xbf16>, vector<8x128xbf16>, vector<8x8xf32> -> vector<8x8xf32>
    %cst_14 = arith.constant dense<0xFF800000> : vector<8xf32>
    %35 = vector.multi_reduction <maximumf>, %34, %cst_14 [0] : vector<8x8xf32> to vector<8xf32>
    %36 = vector.shape_cast %35 : vector<8xf32> to vector<1x8xf32>
    %37 = vector.broadcast %36 : vector<1x8xf32> to vector<8x8xf32>
    %38 = arith.subf %34, %37 : vector<8x8xf32>
    %39 = math.exp %38 : vector<8x8xf32>
    %cst_15 = arith.constant dense<0.000000e+00> : vector<8xf32>
    %40 = vector.multi_reduction <add>, %39, %cst_15 [0] : vector<8x8xf32> to vector<8xf32>
    %41 = vector.shape_cast %40 : vector<8xf32> to vector<1x8xf32>
    %42 = tpu.reciprocal %41 {approx = true} : vector<1x8xf32> -> vector<1x8xf32>
    %43 = vector.broadcast %42 : vector<1x8xf32> to vector<8x8xf32>
    %44 = arith.mulf %39, %43 : vector<8x8xf32>
    %45 = arith.truncf %44 : vector<8x8xf32> to vector<8x8xbf16>
    %cst_16 = arith.constant dense<0.000000e+00> : vector<8x128xf32>
    %46 = tpu.matmul %45, %33, %cst_16 {dimension_numbers = #tpu.dot_dimension_numbers<[1], [0], [0], [1], [0, 0, 1, 1], [], []>} : vector<8x8xbf16>, vector<8x128xbf16>, vector<8x128xf32> -> vector<8x128xf32>
    %c0_17 = arith.constant 0 : index
    %c256 = arith.constant 256 : index
    %47 = vector.load %arg10[%c0_17, %c256] : memref<8x512xbf16, #tpu.memory_space<vmem>>, vector<8x128xbf16>
    %48 = vector.extract_strided_slice %14 {offsets = [0, 256], sizes = [8, 128], strides = [1, 1]} : vector<8x1024xbf16> to vector<8x128xbf16>
    %49 = vector.extract_strided_slice %14 {offsets = [0, 768], sizes = [8, 128], strides = [1, 1]} : vector<8x1024xbf16> to vector<8x128xbf16>
    %cst_18 = arith.constant dense<0.000000e+00> : vector<8x8xf32>
    %50 = tpu.matmul %47, %48, %cst_18 {dimension_numbers = #tpu.dot_dimension_numbers<[1], [1], [0], [0], [0, 0, 1, 0], [], []>} : vector<8x128xbf16>, vector<8x128xbf16>, vector<8x8xf32> -> vector<8x8xf32>
    %cst_19 = arith.constant dense<0xFF800000> : vector<8xf32>
    %51 = vector.multi_reduction <maximumf>, %50, %cst_19 [0] : vector<8x8xf32> to vector<8xf32>
    %52 = vector.shape_cast %51 : vector<8xf32> to vector<1x8xf32>
    %53 = vector.broadcast %52 : vector<1x8xf32> to vector<8x8xf32>
    %54 = arith.subf %50, %53 : vector<8x8xf32>
    %55 = math.exp %54 : vector<8x8xf32>
    %cst_20 = arith.constant dense<0.000000e+00> : vector<8xf32>
    %56 = vector.multi_reduction <add>, %55, %cst_20 [0] : vector<8x8xf32> to vector<8xf32>
    %57 = vector.shape_cast %56 : vector<8xf32> to vector<1x8xf32>
    %58 = tpu.reciprocal %57 {approx = true} : vector<1x8xf32> -> vector<1x8xf32>
    %59 = vector.broadcast %58 : vector<1x8xf32> to vector<8x8xf32>
    %60 = arith.mulf %55, %59 : vector<8x8xf32>
    %61 = arith.truncf %60 : vector<8x8xf32> to vector<8x8xbf16>
    %cst_21 = arith.constant dense<0.000000e+00> : vector<8x128xf32>
    %62 = tpu.matmul %61, %49, %cst_21 {dimension_numbers = #tpu.dot_dimension_numbers<[1], [0], [0], [1], [0, 0, 1, 1], [], []>} : vector<8x8xbf16>, vector<8x128xbf16>, vector<8x128xf32> -> vector<8x128xf32>
    %c0_22 = arith.constant 0 : index
    %c384 = arith.constant 384 : index
    %63 = vector.load %arg10[%c0_22, %c384] : memref<8x512xbf16, #tpu.memory_space<vmem>>, vector<8x128xbf16>
    %64 = vector.extract_strided_slice %14 {offsets = [0, 384], sizes = [8, 128], strides = [1, 1]} : vector<8x1024xbf16> to vector<8x128xbf16>
    %65 = vector.extract_strided_slice %14 {offsets = [0, 896], sizes = [8, 128], strides = [1, 1]} : vector<8x1024xbf16> to vector<8x128xbf16>
    %cst_23 = arith.constant dense<0.000000e+00> : vector<8x8xf32>
    %66 = tpu.matmul %63, %64, %cst_23 {dimension_numbers = #tpu.dot_dimension_numbers<[1], [1], [0], [0], [0, 0, 1, 0], [], []>} : vector<8x128xbf16>, vector<8x128xbf16>, vector<8x8xf32> -> vector<8x8xf32>
    %cst_24 = arith.constant dense<0xFF800000> : vector<8xf32>
    %67 = vector.multi_reduction <maximumf>, %66, %cst_24 [0] : vector<8x8xf32> to vector<8xf32>
    %68 = vector.shape_cast %67 : vector<8xf32> to vector<1x8xf32>
    %69 = vector.broadcast %68 : vector<1x8xf32> to vector<8x8xf32>
    %70 = arith.subf %66, %69 : vector<8x8xf32>
    %71 = math.exp %70 : vector<8x8xf32>
    %cst_25 = arith.constant dense<0.000000e+00> : vector<8xf32>
    %72 = vector.multi_reduction <add>, %71, %cst_25 [0] : vector<8x8xf32> to vector<8xf32>
    %73 = vector.shape_cast %72 : vector<8xf32> to vector<1x8xf32>
    %74 = tpu.reciprocal %73 {approx = true} : vector<1x8xf32> -> vector<1x8xf32>
    %75 = vector.broadcast %74 : vector<1x8xf32> to vector<8x8xf32>
    %76 = arith.mulf %71, %75 : vector<8x8xf32>
    %77 = arith.truncf %76 : vector<8x8xf32> to vector<8x8xbf16>
    %cst_26 = arith.constant dense<0.000000e+00> : vector<8x128xf32>
    %78 = tpu.matmul %77, %65, %cst_26 {dimension_numbers = #tpu.dot_dimension_numbers<[1], [0], [0], [1], [0, 0, 1, 1], [], []>} : vector<8x8xbf16>, vector<8x128xbf16>, vector<8x128xf32> -> vector<8x128xf32>
    %c0_27 = arith.constant 0 : index
    %c0_28 = arith.constant 0 : index
    %79 = vector.load %arg11[%c0_27, %c0_28] : memref<8x512xf32, #tpu.memory_space<vmem>>, vector<8x512xf32>
    %80 = tpu.concatenate %30, %46, %62, %78 in 1 : vector<8x128xf32>, vector<8x128xf32>, vector<8x128xf32>, vector<8x128xf32> -> vector<8x512xf32>
    %81 = arith.addf %79, %80 : vector<8x512xf32>
    %c0_29 = arith.constant 0 : index
    %c0_30 = arith.constant 0 : index
    %82 = vector.load %arg11[%c0_29, %c0_30] : memref<8x512xf32, #tpu.memory_space<vmem>>, vector<8x512xf32>
    tpu.vector_store %arg11[%c0_29, %c0_30], %81 {strides = array<i32>} : memref<8x512xf32, #tpu.memory_space<vmem>>, vector<8x512xf32>,
    %c0_i32_31 = arith.constant 0 : i32
    %83 = arith.cmpi eq, %arg1, %c0_i32_31 : i32
    %84 = arith.extui %83 : i1 to i32
    %c0_i32_32 = arith.constant 0 : i32
    %85 = arith.cmpi ne, %84, %c0_i32_32 : i32
    scf.if %85 {
      %c0_33 = arith.constant 0 : index
      %c0_34 = arith.constant 0 : index
      %86 = vector.load %arg11[%c0_33, %c0_34] : memref<8x512xf32, #tpu.memory_space<vmem>>, vector<8x512xf32>
      %87 = arith.truncf %86 : vector<8x512xf32> to vector<8x512xbf16>
      %c0_35 = arith.constant 0 : index
      %c0_36 = arith.constant 0 : index
      %88 = vector.load %arg7[%c0_35, %c0_36] : memref<512x32xbf16, #tpu.memory_space<vmem>>, vector<512x32xbf16>
      %cst_37 = arith.constant dense<0.000000e+00> : vector<8x32xf32>
      %89 = tpu.matmul %87, %88, %cst_37 {dimension_numbers = #tpu.dot_dimension_numbers<[1], [0], [0], [1], [0, 0, 1, 1], [], []>} : vector<8x512xbf16>, vector<512x32xbf16>, vector<8x32xf32> -> vector<8x32xf32>
      %c0_38 = arith.constant 0 : index
      %c0_39 = arith.constant 0 : index
      %90 = vector.load %arg8[%c0_38, %c0_39] : memref<1x32xf32, #tpu.memory_space<vmem>>, vector<1x32xf32>
      %91 = vector.broadcast %90 : vector<1x32xf32> to vector<8x32xf32>
      %92 = arith.addf %89, %91 : vector<8x32xf32>
      %c0_40 = arith.constant 0 : index
      %c0_41 = arith.constant 0 : index
      %c0_42 = arith.constant 0 : index
      %93 = vector.load %arg9[%c0_40, %c0_41, %c0_42] : memref<1x8x32xf32, #tpu.memory_space<vmem>>, vector<1x8x32xf32>
      %94 = vector.shape_cast %93 : vector<1x8x32xf32> to vector<8x32xf32>
      %95 = vector.shape_cast %92 : vector<8x32xf32> to vector<1x8x32xf32>
      tpu.vector_store %arg9[%c0_40, %c0_41, %c0_42], %95 {strides = array<i32>} : memref<1x8x32xf32, #tpu.memory_space<vmem>>, vector<1x8x32xf32>,
    } else {
    }
    return
  }
  func.func @transform_0(%arg0: i32, %arg1: i32) -> (i32, i32, i32) {
    %c0_i32 = arith.constant 0 : i32
    %c0_i32_0 = arith.constant 0 : i32
    %c0_i32_1 = arith.constant 0 : i32
    return %arg0, %c0_i32, %c0_i32_0 : i32, i32, i32
  }
  func.func @transform_1(%arg0: i32, %arg1: i32) -> (i32, i32) {
    %c0_i32 = arith.constant 0 : i32
    %c0_i32_0 = arith.constant 0 : i32
    %c0_i32_1 = arith.constant 0 : i32
    return %c0_i32, %c0_i32_0 : i32, i32
  }
  func.func @transform_2(%arg0: i32, %arg1: i32) -> (i32, i32) {
    %c0_i32 = arith.constant 0 : i32
    %c0_i32_0 = arith.constant 0 : i32
    %c0_i32_1 = arith.constant 0 : i32
    return %c0_i32, %c0_i32_0 : i32, i32
  }
  func.func @transform_3(%arg0: i32, %arg1: i32) -> (i32, i32) {
    %c0_i32 = arith.constant 0 : i32
    %c0_i32_0 = arith.constant 0 : i32
    %c0_i32_1 = arith.constant 0 : i32
    return %c0_i32, %c0_i32_0 : i32, i32
  }
  func.func @transform_4(%arg0: i32, %arg1: i32) -> (i32, i32) {
    %c0_i32 = arith.constant 0 : i32
    %c0_i32_0 = arith.constant 0 : i32
    %c0_i32_1 = arith.constant 0 : i32
    return %c0_i32, %c0_i32_0 : i32, i32
  }
  func.func @transform_5(%arg0: i32, %arg1: i32) -> (i32, i32) {
    %c0_i32 = arith.constant 0 : i32
    %c0_i32_0 = arith.constant 0 : i32
    %c0_i32_1 = arith.constant 0 : i32
    return %c0_i32, %c0_i32_0 : i32, i32
  }
  func.func @transform_6(%arg0: i32, %arg1: i32) -> (i32, i32) {
    %c0_i32 = arith.constant 0 : i32
    %c0_i32_0 = arith.constant 0 : i32
    %c0_i32_1 = arith.constant 0 : i32
    return %c0_i32, %c0_i32_0 : i32, i32
  }
  func.func @transform_7(%arg0: i32, %arg1: i32) -> (i32, i32, i32) {
    %c0_i32 = arith.constant 0 : i32
    %c0_i32_0 = arith.constant 0 : i32
    %c0_i32_1 = arith.constant 0 : i32
    return %arg0, %c0_i32, %c0_i32_0 : i32, i32, i32
  }
}

</mosaic_0001>

<bundles_post_ra>
// kernel: tpu_custom_call.1
= control target key start
LH: loop header
LB: loop body
LE: loop exit
PB: predicated region body
PF: predicated region fallthrough
CT: control target
= control target key end

     0   :  { %12 = vsyncpa [#allocation5], 0  ;;  %s2168_s0 = inlined_call_operand.vmem [shape: f32[2,8,32], index: 0, kind: input, shape index: {}]   ;;  %s2169_s1 = inlined_call_operand.vmem [shape: bf16[32,512], index: 1, kind: input, shape index: {}]   ;;  %s2170_s2 = inlined_call_operand.vmem [shape: f32[1,512], index: 2, kind: input, shape index: {}]   ;;  %s2171_s3 = inlined_call_operand.vmem [shape: bf16[32,1024], index: 3, kind: input, shape index: {}]   ;;  %s2172_s4 = inlined_call_operand.vmem [shape: f32[1,1024], index: 4, kind: input, shape index: {}]   ;;  %s2173_s5 = inlined_call_operand.vmem [shape: bf16[512,32], index: 5, kind: input, shape index: {}]   ;;  %s2174_s6 = inlined_call_operand.vmem [shape: f32[1,32], index: 6, kind: input, shape index: {}]   ;;  %s2175_s7 = inlined_call_operand.hbm [shape: f32[2,8,32], index: 7, kind: output, shape index: {}]  }
   0x1   :  { %14 = vsyncpa [#allocation5 + $0x1], 0  ;;  %s1797_s24 = smov 0   ;;  %s1799_s25 = smov 0  }
   0x2   :  { %s1801_s26 = smov 0   ;;  %s1803_s27 = smov 0  }
   0x3   :  { %s1805_s28 = smov 0   ;;  %s1807_s29 = smov 0  }
   0x4 LB: > { %s1298_s30 = sadd.s32 4294967295, %s1755_s29   ;;  %s1299_s8 = sadd.s32 4294967294, %s1755_s29   ;;  %s1755_s29 = sphi %s1807_s29, %s20_s29   ;;  %s1751_s28 = sphi %s1805_s28, %s2182_s28   ;;  %s1747_s27 = sphi %s1803_s27, %s2181_s27   ;;  %s1743_s26 = sphi %s1801_s26, %s2180_s26   ;;  %s1739_s25 = sphi %s1799_s25, %s2179_s25   ;;  %s1735_s24 = sphi %s1797_s24, %s2178_s24  }
   0x5   : > { %s32_s9 = sadd.s32 1, %s1751_s28  ;;  %s191_s10 = sadd.s32 1, %s1743_s26 }
   0x6   : > { %p34_p0 = scmp.ge.s32.totalorder %s32_s9, 2  ;;  %p201_p1 = scmp.ne.s32.totalorder %s1743_s26, %s1739_s25 }
   0x7   : > { %p202_p2 = scmp.eq.s32.totalorder %s1298_s30, 1  ;;  %p207_p3 = scmp.ne.s32.totalorder %s1739_s25, %s1735_s24 }
   0x8   : > { %s2184_s9 = smov (%p34_p0, %s32_s9), 0  ;;  %p208_p5 = scmp.eq.s32.totalorder %s1299_s8, 1 }
   0x9   : > { %p1837_p4 = por %p202_p2, %p201_p1  ;;  %s188_s12 = ssub.s32 %s1751_s28, %s2184_s9 }
   0xa   : > { %p1302_p6 = scmp.ge.s32.totalorder %s1755_s29, 1  ;;  %p189_p7 = scmp.eq.s32.totalorder %s188_s12, 0 }
   0xb   : > { %p1844_p8 = por %p208_p5, %p207_p3  ;;  %p251_p9 = scmp.lt.s32.totalorder %s1755_s29, 3 }
   0xc   : > { %s1850_s14 = scalar_select %p189_p7, %s1743_s26, %s191_s10  }
   0xd   : > { %p252_p10 = pnand %p1302_p6, %p251_p9 }
   0xe   : > { %p282_p11 = scmp.lt.s32.totalorder (!%p252_p10), %s1747_s27, 1  ;;  %s279_s18 = sand.u32 (!%p252_p10), 1, %s1739_s25  }
   0xf   : > { %255 = sbr.rel (%p252_p10) target bundleno = 662 (0x296), region = 48  ;;  %s1546_s19 = sshll.u32 (!%p252_p10), %s1747_s27, 3 }
  0x10   : > { %s1303_s20 = sshll.u32 (!%p252_p10), %s279_s18, 3  ;;  %s1224_s23 = scalar_lea.hbm (!%p252_p10), %s2175_s7, %s1546_s19 }
  0x11   : > { %s281_s30 = scalar_lea.vmem (!%p252_p10), [#allocation4], %s1303_s20  ;;  %s1228_s8 = sshll.u32 (!%p252_p10), %s1224_s23, 4  ;;  %s1229_s8 = int_to_ptr.hbm [resolvable:$true] %s1228_s8 }
  0x12   : > { %s1214_s10 = scalar_lea.sflag (!%p252_p10), [#allocation5], %s279_s18  ;;  %s1697_s19 = scalar_lea.hbm (!%p252_p10), %s2175_s7, 16 }
  0x14   : > { %v1323_v0 = vld [vmem:[%s2169_s1 + $0x20] sm:$0xf]  ;;  %v1555_v1 = vld [vmem:[%s2169_s1 + $0x2c] sm:$0xf0]  ;;  %v1553_v2 = vld [vmem:[%s2169_s1 + $0x24] sm:$0xf] }
  0x15   : > { %v1324_v3 = vor.u32 %v1555_v1, %v1323_v0  ;;  %v1325_v4 = vld [vmem:[%s2169_s1 + $0x30] sm:$0xf0]  ;;  %v1331_v5 = vld [vmem:[%s2169_s1 + $0x28] sm:$0xf]  ;;  %v1556_v6 = vld [vmem:[%s2169_s1 + $0x34] sm:$0xf0] }
  0x16   : > { %v1328_v7 = vor.u32 %v1553_v2, %v1325_v4  ;;  %v1332_v8 = vor.u32 %v1556_v6, %v1331_v5  ;;  %v1554_v9 = vld [vmem:[%s2169_s1 + $0x2c] sm:$0xf]  ;;  %v1333_v10 = vld [vmem:[%s2169_s1 + $0x38] sm:$0xf0]  ;;  %v1307_v11 = vld [vmem:[%s2169_s1] sm:$0xf] }
  0x17   : > { %361 = vmatpush.bf16.msra.mxu0 %v1324_v3  ;;  %v1336_v12 = vor.u32 %v1554_v9, %v1333_v10  ;;  %v1551_v13 = vld [vmem:[%s2169_s1 + $0xc] sm:$0xf0]  ;;  %v1549_v14 = vld [vmem:[%s2169_s1 + $0x4] sm:$0xf]  ;;  %v1309_v15 = vld [vmem:[%s2169_s1 + $0x10] sm:$0xf0] }
  0x18   : > { %374 = vmatpush.bf16.msra.mxu1 %v1328_v7  ;;  %387 = vmatpush.bf16.msra.mxu2 %v1332_v8  ;;  %v1308_v16 = vor.u32 %v1551_v13, %v1307_v11  ;;  %v1312_v17 = vor.u32 %v1549_v14, %v1309_v15  ;;  %v1315_v18 = vld [vmem:[%s2169_s1 + $0x8] sm:$0xf]  ;;  %v1552_v19 = vld [vmem:[%s2169_s1 + $0x14] sm:$0xf0]  ;;  %v1550_v20 = vld [vmem:[%s2169_s1 + $0xc] sm:$0xf] }
  0x19   : > { %400 = vmatpush.bf16.msra.mxu3 %v1336_v12  ;;  %v1316_v21 = vor.u32 %v1552_v19, %v1315_v18  ;;  %v1317_v22 = vld [vmem:[%s2169_s1 + $0x18] sm:$0xf0]  ;;  %v1375_v23 = vld [vmem:[%s2171_s3 + $0x40] sm:$0xf]  ;;  %v1565_v26 = vld [vmem:[%s2171_s3 + $0x44] sm:$0xf] }
  0x1a   : > { %v1320_v24 = vor.u32 %v1550_v20, %v1317_v22  ;;  %v1569_v25 = vld [vmem:[%s2171_s3 + $0x5c] sm:$0xf0]  ;;  %v1377_v27 = vld [vmem:[%s2171_s3 + $0x60] sm:$0xf0]  ;;  %s283_s16 = scalar_select %p282_p11, %s1747_s27, 1  ;;  %vm351_vm0 = vcmask 261120  }
  0x1b   : > { %362 = vmatpush.bf16.msra.mxu0 %v1308_v16  ;;  %v1376_v28 = vor.u32 %v1569_v25, %v1375_v23  ;;  %v1380_v29 = vor.u32 %v1565_v26, %v1377_v27  ;;  %v1383_v30 = vld [vmem:[%s2171_s3 + $0x48] sm:$0xf]  ;;  %v1566_v33 = vld [vmem:[%s2171_s3 + $0x4c] sm:$0xf]  ;;  %v1343_v35 = vld [vmem:[%s2171_s3] sm:$0xf] }
  0x1c   : > { %v1570_v31 = vld [vmem:[%s2171_s3 + $0x64] sm:$0xf0]  ;;  %375 = vmatpush.bf16.msra.mxu1 %v1312_v17  ;;  %388 = vmatpush.bf16.msra.mxu2 %v1316_v21  ;;  %v1385_v34 = vld [vmem:[%s2171_s3 + $0x68] sm:$0xf0]  ;;  %s1304_s12 = sshll.u32 %s283_s16, 3  ;;  %vm687_vm1 = vcmask 1043456  }
  0x1d   : > { %v1384_v32 = vor.u32 %v1570_v31, %v1383_v30  ;;  %401 = vmatpush.bf16.msra.mxu3 %v1320_v24  ;;  %v1388_v36 = vor.u32 %v1566_v33, %v1385_v34  ;;  %v1561_v37 = vld [vmem:[%s2171_s3 + $0x1c] sm:$0xf0]  ;;  %v1557_v38 = vld [vmem:[%s2171_s3 + $0x4] sm:$0xf]  ;;  %s285_s22 = scalar_lea.vmem %s2168_s0, %s1304_s12  ;;  %v1351_v41 = vld [vmem:[%s2171_s3 + $0x8] sm:$0xf] }
  0x1e   : > { %v1344_v39 = vor.u32 %v1561_v37, %v1343_v35  ;;  %v1345_v40 = vld [vmem:[%s2171_s3 + $0x20] sm:$0xf0]  ;;  %v1562_v42 = vld [vmem:[%s2171_s3 + $0x24] sm:$0xf0]  ;;  %v1558_v44 = vld [vmem:[%s2171_s3 + $0xc] sm:$0xf] }
  0x1f   : > { %547 = vmatpush.bf16.msrb.mxu0 %v1376_v28  ;;  %v291_v43 = vld [vmem:[%s285_s22] sm:$0xff]  ;;  %v1353_v45 = vld [vmem:[%s2171_s3 + $0x28] sm:$0xf0]  ;;  %v1348_v47 = vor.u32 %v1557_v38, %v1345_v40  ;;  %v1352_v48 = vor.u32 %v1562_v42, %v1351_v41  ;;  %v1399_v50 = vld [vmem:[%s2171_s3 + $0x58] sm:$0xf]  ;;  %vm663_vm2 = vcmask 64512  }
  0x20   : > { %560 = vmatpush.bf16.msrb.mxu1 %v1380_v29  ;;  %573 = vmatpush.bf16.msrb.mxu2 %v1384_v32  ;;  %v292_v46 = vpack.c.bf16 %v291_v43, %v291_v43  ;;  %v1356_v49 = vor.u32 %v1558_v44, %v1353_v45  ;;  %v1572_v51 = vld [vmem:[%s2171_s3 + $0x74] sm:$0xf0]  ;;  %v1391_v53 = vld [vmem:[%s2171_s3 + $0x50] sm:$0xf]  ;;  %v1568_v61 = vld [vmem:[%s2171_s3 + $0x5c] sm:$0xf] }
  0x21   : > { %586 = vmatpush.bf16.msrb.mxu3 %v1388_v36  ;;  %v1400_v52 = vor.u32 %v1572_v51, %v1399_v50  ;;  %v1571_v54 = vld [vmem:[%s2171_s3 + $0x6c] sm:$0xf0]  ;;  %v1367_v55 = vld [vmem:[%s2171_s3 + $0x18] sm:$0xf]  ;;  %v1401_v63 = vld [vmem:[%s2171_s3 + $0x78] sm:$0xf0] }
  0x22   : > { %1337 = vmatmul.msk.bf16.vlgmr.msra.gmra.mxu0 %vm351_vm0, %v292_v46  ;;  %1338 = vmatmul.msk.bf16.vlgmr.msra.gmra.mxu1 %vm351_vm0, %v292_v46  ;;  %v1392_v56 = vor.u32 %v1571_v54, %v1391_v53  ;;  %v1564_v57 = vld [vmem:[%s2171_s3 + $0x34] sm:$0xf0]  ;;  %v1359_v59 = vld [vmem:[%s2171_s3 + $0x10] sm:$0xf]  ;;  %v1404_v0 = vor.u32 %v1568_v61, %v1401_v63  ;;  %v1560_v1 = vld [vmem:[%s2171_s3 + $0x1c] sm:$0xf] }
  0x23   : > { %548 = vmatpush.bf16.msrb.mxu0 %v1344_v39  ;;  %1339 = vmatmul.msk.bf16.vlgmr.msra.gmra.mxu2 %vm351_vm0, %v292_v46  ;;  %v1368_v58 = vor.u32 %v1564_v57, %v1367_v55  ;;  %v1563_v60 = vld [vmem:[%s2171_s3 + $0x2c] sm:$0xf0]  ;;  %v1369_v2 = vld [vmem:[%s2171_s3 + $0x38] sm:$0xf0]  ;;  %v1567_v4 = vld [vmem:[%s2171_s3 + $0x54] sm:$0xf] }
  0x24   : > { %1340 = vmatmul.msk.bf16.vlgmr.msra.gmra.mxu3 %vm351_vm0, %v292_v46  ;;  %561 = vmatpush.bf16.msrb.mxu1 %v1348_v47  ;;  %v1360_v62 = vor.u32 %v1563_v60, %v1359_v59  ;;  %v1372_v3 = vor.u32 %v1560_v1, %v1369_v2  ;;  %v1393_v5 = vld [vmem:[%s2171_s3 + $0x70] sm:$0xf0]  ;;  %v301_v10 = vld [vmem:[%s2170_s2] sm:$0xf]  ;;  %s1226_s16 = sshll.u32 %s281_s30, 4  ;;  %s1691_s27 = sshra.s32 %s1229_s8, 4  ;;  %s1227_s16 = int_to_ptr.vmem [resolvable:$true] %s1226_s16  ;;  %s1692_s27 = int_to_ptr.hbm [resolvable:$true] %s1691_s27 }
  0x25   : > { %574 = vmatpush.bf16.msrb.mxu2 %v1352_v48  ;;  %587 = vmatpush.bf16.msrb.mxu3 %v1356_v49  ;;  %v1396_v6 = vor.u32 %v1567_v4, %v1393_v5  ;;  %v1559_v7 = vld [vmem:[%s2171_s3 + $0x14] sm:$0xf]  ;;  %v303_v11 = vperm.slane %v301_v10, 0  ;;  %v304_v12 = vperm.slane %v301_v10, 1  ;;  %v305_v19 = vperm.slane %v301_v10, 2  ;;  %v439_v30 = vld [vmem:[%s2172_s4] sm:$0xff]  ;;  %p1698_p1 = scmp.lt.s32.totalorder %s1692_s27, %s2175_s7 }
  0x26   : > { %v1361_v8 = vld [vmem:[%s2171_s3 + $0x30] sm:$0xf0]  ;;  %v306_v20 = vperm.slane %v301_v10, 3  ;;  %v441_v32 = vperm.slane %v439_v30, 0  ;;  %v442_v33 = vperm.slane %v439_v30, 1  ;;  %v443_v41 = vperm.slane %v439_v30, 2 }
  0x27   : > { %599 = vmatpush.bf16.msra.mxu0 %v1392_v56  ;;  %v1364_v9 = vor.u32 %v1559_v7, %v1361_v8  ;;  %v444_v42 = vperm.slane %v439_v30, 3  ;;  %v447_v63 = vperm.slane %v439_v30, 6  ;;  %v446_v2 = vperm.slane %v439_v30, 5  ;;  %s1693_s15 = scalar_lea.hbm %s1692_s27, 8 }
  0x28   : > { %612 = vmatpush.bf16.msra.mxu1 %v1396_v6  ;;  %v448_v4 = vperm.slane %v439_v30, 7  ;;  %p1694_p12 = scmp.ne.s32.totalorder %s1692_s27, %s1693_s15  ;;  %p1699_p2 = scmp.lt.s32.totalorder %s1697_s19, %s1693_s15 }
  0x29   : > { %625 = vmatpush.bf16.msra.mxu2 %v1400_v52  ;;  %638 = vmatpush.bf16.msra.mxu3 %v1404_v0 }
  0x2a   : > { %p1695_p13 = pnand %p1694_p12, %p1837_p4  ;;  %p1700_p3 = por %p1699_p2, %p1698_p1 }
  0x2b   : > { %600 = vmatpush.bf16.msra.mxu0 %v1360_v62  ;;  %v445_v62 = vperm.slane %v439_v30, 4 }
  0x2c   : > { %613 = vmatpush.bf16.msra.mxu1 %v1364_v9  ;;  %p1696_p0 = pneg %p1695_p13 }
  0x2d   : > { %626 = vmatpush.bf16.msra.mxu2 %v1368_v58  ;;  %639 = vmatpush.bf16.msra.mxu3 %v1372_v3 }
  0x2e   : > { %p1701_p5 = pnand %p1700_p3, %p1696_p0 }
  0x32   : > { %1405 = vmatmul.msk.bf16.vlgmr.msrb.gmra.mxu0 %vm351_vm0, %v292_v46  ;;  %1406 = vmatmul.msk.bf16.vlgmr.msrb.gmra.mxu1 %vm351_vm0, %v292_v46 }
  0x33   : > { %1407 = vmatmul.msk.bf16.vlgmr.msrb.gmra.mxu2 %vm351_vm0, %v292_v46 }
  0x34   : > { %1408 = vmatmul.msk.bf16.vlgmr.msrb.gmra.mxu3 %vm351_vm0, %v292_v46 }
  0x42   : > { %1409 = vmatmul.msk.bf16.vlgmr.msra.gmra.mxu0 %vm351_vm0, %v292_v46  ;;  %1410 = vmatmul.msk.bf16.vlgmr.msra.gmra.mxu1 %vm351_vm0, %v292_v46 }
  0x43   : > { %1411 = vmatmul.msk.bf16.vlgmr.msra.gmra.mxu2 %vm351_vm0, %v292_v46 }
  0x44   : > { %1412 = vmatmul.msk.bf16.vlgmr.msra.gmra.mxu3 %vm351_vm0, %v292_v46 }
  0x9f   : > { %v364_v13 = vpop.f32.mrf.mxu0  ;;  %v377_v14 = vpop.f32.mrf.mxu1 }
  0xa0   : > { %v365_v15 = vadd.f32 %v364_v13, %v303_v11  ;;  %v378_v16 = vadd.f32 %v377_v14, %v304_v12 }
  0xa2   : > { %v407_v17 = vmul.f32 0.35355338, %v365_v15  ;;  %v408_v18 = vmul.f32 0.35355338, %v378_v16 }
  0xa4   : > { %v411_v21 = vpack.c.bf16 %v408_v18, %v407_v17 }
  0xa6   : > { %413 = vst [vmem:[#allocation2] sm:$0xff] %v411_v21  ;;  %v390_v22 = vpop.f32.mrf.mxu2 }
  0xa7   : > { %v403_v23 = vpop.f32.mrf.mxu3  ;;  %v366_v24 = vpop.f32.mrf.mxu0  ;;  %v391_v26 = vadd.f32 %v390_v22, %v305_v19 }
  0xa8   : > { %v379_v25 = vpop.f32.mrf.mxu1  ;;  %v404_v27 = vadd.f32 %v403_v23, %v306_v20 }
  0xa9   : > { %v409_v28 = vmul.f32 0.35355338, %v391_v26 }
  0xaa   : > { %v410_v29 = vmul.f32 0.35355338, %v404_v27 }
  0xac   : > { %v412_v31 = vpack.c.bf16 %v410_v29, %v409_v28 }
  0xad   : > { %v649_v52 = vld [vmem:[#allocation2] sm:$0xf]  ;;  %v704_v57 = vld [vmem:[#allocation2 + $0x4] sm:$0xf] }
  0xae   : > { %414 = vst [vmem:[#allocation2 + $0x8] sm:$0xff] %v412_v31  ;;  %v392_v34 = vpop.f32.mrf.mxu2 }
  0xaf   : > { %v405_v35 = vpop.f32.mrf.mxu3  ;;  %v550_v36 = vpop.f32.mrf.mxu0 }
  0xb0   : > { %v563_v37 = vpop.f32.mrf.mxu1  ;;  %v551_v38 = vadd.f32 %v550_v36, %v441_v32 }
  0xb1   : > { %v564_v39 = vadd.f32 %v563_v37, %v442_v33 }
  0xb3   : > { %v645_v40 = vpack.c.bf16 %v564_v39, %v551_v38 }
  0xb5   : > { %v706_v43 = vunpack.c.h.b16 %v645_v40  ;;  %657 = vmatpush.bf16.xpose.msrb.mxu0 %v645_v40  ;;  %v764_v58 = vld [vmem:[#allocation2 + $0x8] sm:$0xf]  ;;  %v817_v59 = vld [vmem:[#allocation2 + $0xc] sm:$0xf] }
  0xb6   : > { %v576_v45 = vpop.f32.mrf.mxu2 }
  0xb7   : > { %v707_v44 = vpack.c.b16 %v706_v43, %v706_v43  ;;  %v589_v46 = vpop.f32.mrf.mxu3  ;;  %v552_v47 = vpop.f32.mrf.mxu0  ;;  %v577_v49 = vadd.f32 %v576_v45, %v443_v41 }
  0xb8   : > { %v565_v48 = vpop.f32.mrf.mxu1  ;;  %v590_v50 = vadd.f32 %v589_v46, %v444_v42 }
  0xb9   : > { %716 = vmatpush.bf16.xpose.msrb.mxu2 %v707_v44 }
  0xba   : > { %v646_v51 = vpack.c.bf16 %v590_v50, %v577_v49 }
  0xbc   : > { %v819_v53 = vunpack.c.h.b16 %v646_v51  ;;  %658 = vmatmul.bf16.vlgmr.msrb.gmra.mxu0 %v649_v52 }
  0xbd   : > { %772 = vmatpush.bf16.xpose.msra.mxu0 %v646_v51 }
  0xbe   : > { %v820_v54 = vpack.c.b16 %v819_v53, %v819_v53  ;;  %v578_v55 = vpop.f32.mrf.mxu2 }
  0xbf   : > { %v591_v56 = vpop.f32.mrf.mxu3  ;;  %v602_v60 = vpop.f32.mrf.mxu0 }
  0xc0   : > { %717 = vmatmul.bf16.vlgmr.msrb.gmra.mxu2 %v704_v57  ;;  %v603_v0 = vadd.f32 %v602_v60, %v445_v62  ;;  %v615_v3 = vpop.f32.mrf.mxu1 }
  0xc1   : > { %829 = vmatpush.bf16.xpose.msra.mxu2 %v820_v54  ;;  %v616_v6 = vadd.f32 %v615_v3, %v446_v2 }
  0xc3   : > { %v647_v9 = vpack.c.bf16 %v616_v6, %v603_v0 }
  0xc5   : > { %v743_v11 = vunpack.c.h.b16 %v647_v9  ;;  %v689_v13 = vsel %vm687_vm1, %v647_v9, 0 }
  0xc6   : > { %v628_v61 = vpop.f32.mrf.mxu2  ;;  %698 = vmatpush.bf16.msrb.mxu1 %v689_v13 }
  0xc7   : > { %v604_v1 = vpop.f32.mrf.mxu0  ;;  %v629_v5 = vadd.f32 %v628_v61, %v447_v63  ;;  %v641_v8 = vpop.f32.mrf.mxu3  ;;  %v744_v14 = vpack.c.b16 %v743_v11, %v743_v11 }
  0xc8   : > { %v642_v10 = vadd.f32 %v641_v8, %v448_v4  ;;  %v617_v17 = vpop.f32.mrf.mxu1 }
  0xc9   : > { %v749_v19 = vsel %vm687_vm1, %v744_v14, 0 }
  0xca   : > { %v648_v12 = vpack.c.bf16 %v642_v10, %v629_v5  ;;  %758 = vmatpush.bf16.msrb.mxu3 %v749_v19  ;;  %v1580_v19 = vld [vmem:[%s2173_s5 + $0x38] sm:$0xff] }
  0xcb   : > { %1160 = vmatpush.bf16.msrb.mxu0 %v1580_v19 }
  0xcc   : > { %773 = vmatmul.bf16.vlgmr.msra.gmra.mxu0 %v764_v58  ;;  %v856_v15 = vunpack.c.h.b16 %v648_v12  ;;  %v802_v16 = vsel %vm687_vm1, %v648_v12, 0 }
  0xcd   : > { %811 = vmatpush.bf16.msra.mxu1 %v802_v16 }
  0xce   : > { %v630_v7 = vpop.f32.mrf.mxu2  ;;  %v857_v18 = vpack.c.b16 %v856_v15, %v856_v15 }
  0xcf   : > { %v643_v20 = vpop.f32.mrf.mxu3 }
  0xd0   : > { %830 = vmatmul.bf16.vlgmr.msra.gmra.mxu2 %v817_v59  ;;  %v862_v21 = vsel %vm687_vm1, %v857_v18, 0 }
  0xd1   : > { %871 = vmatpush.bf16.msra.mxu3 %v862_v21 }
 0x139   : > { %v659_v22 = vpop.f32.mrf.mxu0 }
 0x13a   : > { %v664_v23 = vsel %vm663_vm2, %v659_v22, -inf }
 0x13b   : > { %v665_v24 = vrot.slane %v664_v23, 4 }
 0x13d   : > { %v666_v25 = vmax.f32 %v664_v23, %v665_v24  ;;  %v1579_v24 = vld [vmem:[%s2173_s5 + $0x30] sm:$0xff] }
 0x13e   : > { %1161 = vmatpush.bf16.msrb.mxu0 %v1579_v24 }
 0x13f   : > { %v667_v26 = vrot.slane %v666_v25, 2 }
 0x141   : > { %v668_v27 = vmax.f32 %v666_v25, %v667_v26  ;;  %v661_v28 = vpop.f32.mrf.mxu0  ;;  %v1596_v25 = vld [vmem:[%s2173_s5 + $0xb8] sm:$0xff] }
 0x142   : > { %v1588_v28 = vld [vmem:[%s2173_s5 + $0x78] sm:$0xff]  ;;  %1186 = vmatpush.bf16.msrb.mxu2 %v1596_v25 }
 0x143   : > { %v669_v29 = vrot.slane %v668_v27, 1  ;;  %v718_v30 = vpop.f32.mrf.mxu2 }
 0x144   : > { %v722_v31 = vsel %vm663_vm2, %v718_v30, -inf }
 0x145   : > { %v670_v32 = vmax.f32 %v668_v27, %v669_v29  ;;  %v723_v33 = vrot.slane %v722_v31, 4 }
 0x147   : > { %v671_v34 = vsub.f32 %v659_v22, %v670_v32  ;;  %v724_v35 = vmax.f32 %v722_v31, %v723_v33  ;;  %v1578_v32 = vld [vmem:[%s2173_s5 + $0x28] sm:$0xff] }
 0x148   : > { %1162 = vmatpush.bf16.msrb.mxu0 %v1578_v32 }
 0x149   : > { %v672_v36 = vmul.f32 1.442695, %v671_v34  ;;  %v725_v37 = vrot.slane %v724_v35, 2  ;;  %v774_v38 = vpop.f32.mrf.mxu0 }
 0x14a   : > { %v778_v39 = vsel %vm663_vm2, %v774_v38, -inf }
 0x14b   : > { %1661 = vpow2.f32 %v672_v36  ;;  %v726_v40 = vmax.f32 %v724_v35, %v725_v37  ;;  %v779_v41 = vrot.slane %v778_v39, 4  ;;  %v720_v42 = vpop.f32.mrf.mxu2  ;;  %v1587_v35 = vld [vmem:[%s2173_s5 + $0x70] sm:$0xff]  ;;  %v1594_v37 = vld [vmem:[%s2173_s5 + $0xa8] sm:$0xff] }
 0x14d   : > { %v727_v43 = vrot.slane %v726_v40, 1  ;;  %v780_v44 = vmax.f32 %v778_v39, %v779_v41 }
 0x14f   : > { %v728_v45 = vmax.f32 %v726_v40, %v727_v43  ;;  %v781_v46 = vrot.slane %v780_v44, 2  ;;  %v1577_v40 = vld [vmem:[%s2173_s5 + $0x20] sm:$0xff]  ;;  %v1586_v43 = vld [vmem:[%s2173_s5 + $0x68] sm:$0xff] }
 0x150   : > { %1163 = vmatpush.bf16.msrb.mxu0 %v1577_v40 }
 0x151   : > { %v1662_v47 = vpop.eup %1661  ;;  %v729_v48 = vsub.f32 %v718_v30, %v728_v45  ;;  %v782_v49 = vmax.f32 %v780_v44, %v781_v46  ;;  %v776_v50 = vpop.f32.mrf.mxu0  ;;  %v1595_v30 = vld [vmem:[%s2173_s5 + $0xb0] sm:$0xff] }
 0x152   : > { %v674_v51 = vsel %vm663_vm2, %v1662_v47, 0.0  ;;  %1187 = vmatpush.bf16.msrb.mxu2 %v1595_v30 }
 0x153   : > { %v675_v52 = vrot.slane %v674_v51, 4  ;;  %v730_v53 = vmul.f32 1.442695, %v729_v48  ;;  %v783_v54 = vrot.slane %v782_v49, 1  ;;  %v831_v55 = vpop.f32.mrf.mxu2 }
 0x154   : > { %v835_v56 = vsel %vm663_vm2, %v831_v55, -inf }
 0x155   : > { %v676_v57 = vadd.f32 %v675_v52, %v674_v51  ;;  %1663 = vpow2.f32 %v730_v53  ;;  %v784_v58 = vmax.f32 %v782_v49, %v783_v54  ;;  %v836_v59 = vrot.slane %v835_v56, 4  ;;  %v1575_v52 = vld [vmem:[%s2173_s5 + $0x10] sm:$0xff] }
 0x156   : > { %1188 = vmatpush.bf16.msrb.mxu2 %v1594_v37 }
 0x157   : > { %v677_v60 = vrot.slane %v676_v57, 2  ;;  %v785_v61 = vsub.f32 %v774_v38, %v784_v58  ;;  %v837_v62 = vmax.f32 %v835_v56, %v836_v59  ;;  %v1573_v59 = vld [vmem:[%s2173_s5] sm:$0xff] }
 0x159   : > { %v678_v63 = vadd.f32 %v677_v60, %v676_v57  ;;  %v786_v0 = vmul.f32 1.442695, %v785_v61  ;;  %v838_v1 = vrot.slane %v837_v62, 2  ;;  %v1585_v60 = vld [vmem:[%s2173_s5 + $0x60] sm:$0xff] }
 0x15a   : > { %v1593_v61 = vld [vmem:[%s2173_s5 + $0xa0] sm:$0xff] }
 0x15b   : > { %v1664_v2 = vpop.eup %1663  ;;  %v679_v3 = vrot.slane %v678_v63, 1  ;;  %1665 = vpow2.f32 %v786_v0  ;;  %v839_v4 = vmax.f32 %v837_v62, %v838_v1  ;;  %v833_v5 = vpop.f32.mrf.mxu2  ;;  %1189 = vmatpush.bf16.msrb.mxu2 %v1593_v61  ;;  %v1584_v62 = vld [vmem:[%s2173_s5 + $0x58] sm:$0xff]  ;;  %v1583_v1 = vld [vmem:[%s2173_s5 + $0x50] sm:$0xff] }
 0x15c   : > { %v732_v6 = vsel %vm663_vm2, %v1664_v2, 0.0  ;;  %v1604_v0 = vld [vmem:[%s2173_s5 + $0xf8] sm:$0xff]  ;;  %v1602_v5 = vld [vmem:[%s2173_s5 + $0xe8] sm:$0xff] }
 0x15d   : > { %v680_v7 = vadd.f32 %v679_v3, %v678_v63  ;;  %v733_v8 = vrot.slane %v732_v6, 4  ;;  %v840_v9 = vrot.slane %v839_v4, 1  ;;  %v1592_v63 = vld [vmem:[%s2173_s5 + $0x98] sm:$0xff]  ;;  %v1603_v3 = vld [vmem:[%s2173_s5 + $0xf0] sm:$0xff] }
 0x15f   : > { %1667 = vrcp.f32 %v680_v7  ;;  %v734_v10 = vadd.f32 %v733_v8, %v732_v6  ;;  %v841_v11 = vmax.f32 %v839_v4, %v840_v9  ;;  %1190 = vmatpush.bf16.msrb.mxu2 %v1592_v63  ;;  %v1582_v4 = vld [vmem:[%s2173_s5 + $0x48] sm:$0xff]  ;;  %v1581_v7 = vld [vmem:[%s2173_s5 + $0x40] sm:$0xff] }
 0x160   : > { %v1590_v6 = vld [vmem:[%s2173_s5 + $0x88] sm:$0xff]  ;;  %v1589_v8 = vld [vmem:[%s2173_s5 + $0x80] sm:$0xff] }
 0x161   : > { %v1666_v12 = vpop.eup %1665  ;;  %v735_v13 = vrot.slane %v734_v10, 2  ;;  %v842_v14 = vsub.f32 %v831_v55, %v841_v11  ;;  %v1574_v55 = vld [vmem:[%s2173_s5 + $0x8] sm:$0xff]  ;;  %v1601_v9 = vld [vmem:[%s2173_s5 + $0xe0] sm:$0xff]  ;;  %v1599_v11 = vld [vmem:[%s2173_s5 + $0xd0] sm:$0xff] }
 0x162   : > { %v788_v15 = vsel %vm663_vm2, %v1666_v12, 0.0 }
 0x163   : > { %v736_v16 = vadd.f32 %v735_v13, %v734_v10  ;;  %v789_v17 = vrot.slane %v788_v15, 4  ;;  %v843_v18 = vmul.f32 1.442695, %v842_v14  ;;  %v1600_v10 = vld [vmem:[%s2173_s5 + $0xd8] sm:$0xff]  ;;  %v1597_v13 = vld [vmem:[%s2173_s5 + $0xc0] sm:$0xff] }
 0x165   : > { %v1668_v20 = vpop.eup %1667  ;;  %v737_v21 = vrot.slane %v736_v16, 1  ;;  %v790_v22 = vadd.f32 %v789_v17, %v788_v15  ;;  %1669 = vpow2.f32 %v843_v18 }
 0x166   : > { %v682_v23 = vmul.f32 %v1668_v20, %v1662_v47  ;;  %v1576_v47 = vld [vmem:[%s2173_s5 + $0x18] sm:$0xff] }
 0x167   : > { %v738_v26 = vadd.f32 %v737_v21, %v736_v16  ;;  %v791_v27 = vrot.slane %v790_v22, 2  ;;  %1164 = vmatpush.bf16.msrb.mxu0 %v1576_v47 }
 0x168   : > { %v683_v29 = vpack.c.bf16 %v682_v23, %v682_v23 }
 0x169   : > { %1671 = vrcp.f32 %v738_v26  ;;  %v792_v31 = vadd.f32 %v791_v27, %v790_v22 }
 0x16a   : > { %1413 = vmatmul.msk.bf16.vlgmr.msrb.gmra.mxu1 %vm663_vm2, %v683_v29 }
 0x16b   : > { %v1670_v33 = vpop.eup %1669  ;;  %v793_v34 = vrot.slane %v792_v31, 1  ;;  %1173 = vmatpush.bf16.msrb.mxu1 %v1588_v28  ;;  %1165 = vmatpush.bf16.msrb.mxu0 %v1575_v52 }
 0x16c   : > { %v845_v36 = vsel %vm663_vm2, %v1670_v33, 0.0 }
 0x16d   : > { %v794_v38 = vadd.f32 %v793_v34, %v792_v31  ;;  %v846_v39 = vrot.slane %v845_v36, 4  ;;  %v1660_v31 = vld [vmem:[%s2174_s6] ss:$0 sm:$0xff] }
 0x16f   : > { %v1672_v41 = vpop.eup %1671  ;;  %1673 = vrcp.f32 %v794_v38  ;;  %v847_v42 = vadd.f32 %v846_v39, %v845_v36  ;;  %1174 = vmatpush.bf16.msrb.mxu1 %v1587_v35  ;;  %1166 = vmatpush.bf16.msrb.mxu0 %v1574_v55 }
 0x170   : > { %v740_v44 = vmul.f32 %v1672_v41, %v1664_v2  ;;  %v1591_v2 = vld [vmem:[%s2173_s5 + $0x90] sm:$0xff] }
 0x171   : > { %v848_v45 = vrot.slane %v847_v42, 2  ;;  %1191 = vmatpush.bf16.msrb.mxu2 %v1591_v2 }
 0x172   : > { %v741_v46 = vpack.c.bf16 %v740_v44, %v740_v44 }
 0x173   : > { %v849_v48 = vadd.f32 %v848_v45, %v847_v42  ;;  %1175 = vmatpush.bf16.msrb.mxu1 %v1586_v43  ;;  %1167 = vmatpush.bf16.msrb.mxu0 %v1573_v59 }
 0x174   : > { %1414 = vmatmul.msk.bf16.vlgmr.msrb.gmra.mxu3 %vm663_vm2, %v741_v46 }
 0x175   : > { %v1674_v49 = vpop.eup %1673  ;;  %v850_v50 = vrot.slane %v849_v48, 1  ;;  %1199 = vmatpush.bf16.msrb.mxu3 %v1604_v0  ;;  %1192 = vmatpush.bf16.msrb.mxu2 %v1590_v6 }
 0x176   : > { %v796_v51 = vmul.f32 %v1674_v49, %v1666_v12  ;;  %v1598_v12 = vld [vmem:[%s2173_s5 + $0xc8] sm:$0xff] }
 0x177   : > { %v851_v53 = vadd.f32 %v850_v50, %v849_v48  ;;  %1176 = vmatpush.bf16.msrb.mxu1 %v1585_v60 }
 0x178   : > { %v797_v54 = vpack.c.bf16 %v796_v51, %v796_v51 }
 0x179   : > { %1675 = vrcp.f32 %v851_v53  ;;  %1200 = vmatpush.bf16.msrb.mxu3 %v1603_v3  ;;  %1193 = vmatpush.bf16.msrb.mxu2 %v1589_v8 }
 0x17a   : > { %1415 = vmatmul.msk.bf16.vlgmr.msra.gmra.mxu1 %vm663_vm2, %v797_v54 }
 0x17b   : > { %1177 = vmatpush.bf16.msrb.mxu1 %v1584_v62 }
 0x17d   : > { %1201 = vmatpush.bf16.msrb.mxu3 %v1602_v5 }
 0x17f   : > { %v1676_v56 = vpop.eup %1675  ;;  %1178 = vmatpush.bf16.msrb.mxu1 %v1583_v1 }
 0x180   : > { %v853_v57 = vmul.f32 %v1676_v56, %v1670_v33 }
 0x181   : > { %1202 = vmatpush.bf16.msrb.mxu3 %v1601_v9 }
 0x182   : > { %v854_v58 = vpack.c.bf16 %v853_v57, %v853_v57 }
 0x183   : > { %1179 = vmatpush.bf16.msrb.mxu1 %v1582_v4 }
 0x184   : > { %1416 = vmatmul.msk.bf16.vlgmr.msra.gmra.mxu3 %vm663_vm2, %v854_v58 }
 0x185   : > { %1203 = vmatpush.bf16.msrb.mxu3 %v1600_v10 }
 0x187   : > { %1180 = vmatpush.bf16.msrb.mxu1 %v1581_v7 }
 0x189   : > { %1204 = vmatpush.bf16.msrb.mxu3 %v1599_v11 }
 0x18d   : > { %1205 = vmatpush.bf16.msrb.mxu3 %v1598_v12 }
 0x191   : > { %1206 = vmatpush.bf16.msrb.mxu3 %v1597_v13 }
 0x1e7   : > { %v700_v14 = vpop.f32.mrf.mxu1 }
 0x1e8   : > { %v896_v15 = vpack.c.bf16 %v700_v14, %v700_v14 }
 0x1ea   : > { %1168 = vmatmul.bf16.vlgmr.msrb.gmra.mxu0 %v896_v15 }
 0x1ef   : > { %v702_v16 = vpop.f32.mrf.mxu1 }
 0x1f7   : > { %v760_v17 = vpop.f32.mrf.mxu3  ;;  %v813_v18 = vpop.f32.mrf.mxu1 }
 0x1f8   : > { %v897_v19 = vpack.c.bf16 %v760_v17, %v760_v17  ;;  %v898_v20 = vpack.c.bf16 %v813_v18, %v813_v18 }
 0x1fa   : > { %1181 = vmatmul.bf16.vlgmr.msrb.gmra.mxu1 %v897_v19  ;;  %1194 = vmatmul.bf16.vlgmr.msrb.gmra.mxu2 %v898_v20 }
 0x1ff   : > { %v762_v21 = vpop.f32.mrf.mxu3  ;;  %v815_v22 = vpop.f32.mrf.mxu1 }
 0x207   : > { %v873_v23 = vpop.f32.mrf.mxu3 }
 0x208   : > { %v899_v24 = vpack.c.bf16 %v873_v23, %v873_v23 }
 0x20a   : > { %1207 = vmatmul.bf16.vlgmr.msrb.gmra.mxu3 %v899_v24 }
 0x20f   : > { %v875_v25 = vpop.f32.mrf.mxu3 }
 0x267   : > { %v1169_v26 = vpop.f32.mrf.mxu0 }
 0x268   : > { %v1170_v33 = vadd.f32 %v1660_v31, %v1169_v26 }
 0x26f   : > { %v1171_v27 = vpop.f32.mrf.mxu0 }
 0x277   : > { %v1182_v28 = vpop.f32.mrf.mxu1 }
 0x278   : > { %v1183_v34 = vadd.f32 %v1182_v28, %v1170_v33 }
 0x27d   : > { %v1195_v29 = vpop.f32.mrf.mxu2 }
 0x27e   : > { %v1196_v35 = vadd.f32 %v1195_v29, %v1183_v34 }
 0x27f   : > { %v1184_v30 = vpop.f32.mrf.mxu1 }
 0x285   : > { %v1197_v32 = vpop.f32.mrf.mxu2 }
 0x28d   : > { %v1208_v36 = vpop.f32.mrf.mxu3 }
 0x28e   : > { %v1209_v37 = vadd.f32 %v1208_v36, %v1196_v35 }
 0x290   : > { %1212 = vst.msk [vmem:[%s281_s30] sm:$0xff] %vm351_vm0, %v1209_v37 }
 0x291   : > { %1704 = shalt.err (!%p1701_p5)
}
 0x292   : > { %1605 = dma.vmem_to_hbm [thread:$0]  (%p1837_p4), %s1227_s16, 128, %s1229_s8, %s1214_s10  }
 0x295   : > { %v1210_v38 = vpop.f32.mrf.mxu3 }
 0x296 PF: > { %p1611_p6 = scmp.ge.s32.totalorder %s1755_s29, 2  ;;  %s1240_s18 = sand.u32 1, %s1735_s24  }
 0x297   : > { %s1241_s22 = scalar_lea.sflag [#allocation5], %s1240_s18 }
 0x298   : > { %p1608_p7 = pnand %p1611_p6, %p1844_p8 }
 0x29a   : > { %p1609_p9 = pneg %p1608_p7 }
 0x29c   : > { %1730 = dma.done.wait (%p1609_p9), %s1241_s22, 128  }
 0x29d   : > { %1732 = vsyncadd (%p1609_p9), %s1241_s22, 4294967168  ;;  %s20_s29 = sadd.s32 1, %s1755_s29   ;;  %s2178_s24 = smov %s1739_s25 }
 0x29e   : > { %p17_p10 = scmp.ge.s32.totalorder %s20_s29, 4   ;;  %s2179_s25 = smov %s1743_s26 }
 0x29f   : > { %s2180_s26 = smov %s1850_s14  ;;  %s2181_s27 = smov %s1751_s28 }
 0x2a0   : > { %s2182_s28 = smov %s2184_s9  ;;  %19 = sbr.rel (!%p17_p10) target bundleno = 4 (0x4), region = 92 }
 0x2a5   :  { %1247 = vsyncpa [#allocation5], 1 }
 0x2a6   :  { %1249 = vsyncpa [#allocation5 + $0x1], 1 }

</bundles_post_ra>
